<compile_context>
chip_gen: v7x
topology: tpu7x:2x2x1
jax: 0.10.0
libtpu: 0.0.40
codegen_flags: <defaults>
</compile_context>

<pallas_src>
import jax
import jax.numpy as jnp
from jax.experimental import pallas as pl
from jax.experimental.pallas import tpu as pltpu

_MIB = 1024 * 1024


def _weight_layer_kernel(x_ref, w_ref, o_ref):
    # x_ref: (tb, S, F) VMEM; w_ref: (1, S, 1) f32 VMEM; o_ref: (tb, F) VMEM.
    x = x_ref[...].astype(jnp.float32)
    w = w_ref[...]                                   # broadcasts over (tb, S, F)
    o_ref[...] = jnp.sum(x * w, axis=1).astype(o_ref.dtype)


def _vmem_capacity_bytes():
    try:
        info = pltpu.get_tpu_info()
        cap = getattr(info, "vmem_capacity_bytes", None)
        if cap:
            return int(cap)
    except Exception:
        pass
    return 64 * _MIB  # conservative default (v7x per-TensorCore VMEM)


def _padded_block_bytes(shape, dtype):
    """VMEM footprint of a block after (sublane, lane) layout padding."""
    itemsize = jnp.dtype(dtype).itemsize
    sub = max(8, 32 // itemsize)          # f32 -> 8, bf16 -> 16, int8 -> 32 sublanes
    dims = [int(d) for d in shape]
    dims[-1] = pl.cdiv(dims[-1], 128) * 128
    if len(dims) >= 2:
        dims[-2] = pl.cdiv(dims[-2], sub) * sub
    n = 1
    for d in dims:
        n *= d
    return n * itemsize


def _choose_batch_tile(B, S, F, dtype, vmem_cap):
    in_row_bytes = _padded_block_bytes((1, S, F), dtype)   # padded bytes / batch row
    # ~16 MiB blocks on 128 MiB-VMEM parts (v5e/v6e), ~8 MiB on v7x (64 MiB).
    target = min(16 * _MIB, max(2 * _MIB, vmem_cap // 8))
    rows = max(1, target // in_row_bytes)
    # Guarantee >= 2 grid steps for non-trivial inputs (megacore + overlap).
    if B >= 16 and B * in_row_bytes > 2 * _MIB:
        rows = min(rows, B // 2)
    if rows >= B:
        return B
    rows = max(8, (rows // 8) * 8)        # (8,128) rule: output-block rows % 8 == 0
    if rows >= B:
        return B
    # Prefer a multiple of 8 that divides B (no padded trailing-block DMA),
    # but never shrink the tile by more than ~2x for it.
    for d in range(rows, max(8, rows // 2) - 1, -8):
        if B % d == 0:
            return d
    return rows


def weight_layer(x, w, *, tb=None):
    """out[b, f] = sum_s x[b, s, f] * w[s, 0]  (== squeeze(x.transpose(1,2) @ w))."""
    B, S, F = x.shape
    assert w.shape in ((S, 1), (S,), (1, S, 1))
    w3 = jnp.reshape(w, (1, S, 1)).astype(jnp.float32)

    vmem_cap = _vmem_capacity_bytes()
    if tb is None:
        tb = _choose_batch_tile(B, S, F, x.dtype, vmem_cap)
    tb = max(1, min(int(tb), B))
    grid = (pl.cdiv(B, tb),)

    # Scoped-VMEM budget for the double-buffered blocks (padded footprint).
    in_blk = _padded_block_bytes((tb, S, F), x.dtype)
    out_blk = _padded_block_bytes((tb, F), x.dtype)
    footprint = 2 * (in_blk + out_blk) + _padded_block_bytes((1, S, 1), jnp.float32)
    vmem_limit = int(min(vmem_cap - 4 * _MIB, max(32 * _MIB, footprint + 8 * _MIB)))

    cost = pl.CostEstimate(
        flops=2 * B * S * F,
        bytes_accessed=(B * S * F + B * F) * x.dtype.itemsize + S * 4,
        transcendentals=0,
    )

    return pl.pallas_call(
        _weight_layer_kernel,
        out_shape=jax.ShapeDtypeStruct((B, F), x.dtype),
        grid=grid,
        in_specs=[
            # Tiled over batch; full (S, F) extent in the last two dims.
            pl.BlockSpec((tb, S, F), lambda i: (i, 0, 0)),
            # Small weight block, same (1, S, 1) tile every step (stays resident).
            pl.BlockSpec((1, S, 1), lambda i: (0, 0, 0)),
        ],
        out_specs=pl.BlockSpec((tb, F), lambda i: (i, 0)),
        compiler_params=pltpu.CompilerParams(
            dimension_semantics=("parallel",),
            vmem_limit_bytes=vmem_limit,
        ),
        cost_estimate=cost,
    )(x, w3)


def _reference(x, w):
    # Mirrors the torch forward (f32 matmul): transpose(1,2) @ kernel, squeeze(-1).
    w2 = jnp.reshape(w, (x.shape[1], 1)).astype(jnp.float32)
    out = jnp.matmul(jnp.transpose(x, (0, 2, 1)).astype(jnp.float32), w2)
    return jnp.squeeze(out, axis=-1).astype(x.dtype)


if __name__ == "__main__":
    key = jax.random.PRNGKey(0)
    kx, kw, kx2 = jax.random.split(key, 3)

    # Shapes consistent with the module defaults: kernel is (8, 1) -> S = 8.
    B, S, F = 2, 8, 32
    x = jax.random.normal(kx, (B, S, F), dtype=jnp.float32)
    w = jax.random.uniform(kw, (S, 1), dtype=jnp.float32)   # nn.init.uniform_ -> U[0, 1)

    out = jax.block_until_ready(weight_layer(x, w))
    ref = _reference(x, w)
    assert out.shape == (B, F)
    assert jnp.allclose(out, ref, atol=1e-5, rtol=1e-5)

    # Exercise the batch grid + a partial trailing block (B=20, tb=8 -> 3 steps).
    B2 = 20
    x2 = jax.random.normal(kx2, (B2, S, F), dtype=jnp.float32)
    out2 = jax.block_until_ready(weight_layer(x2, w, tb=8))
    ref2 = _reference(x2, w)
    assert out2.shape == (B2, F)
    assert jnp.allclose(out2, ref2, atol=1e-5, rtol=1e-5)

    # bf16 input: f32 accumulation in-kernel, cast at the store.
    x3 = x2.astype(jnp.bfloat16)
    out3 = jax.block_until_ready(weight_layer(x3, w, tb=8))
    ref3 = _reference(x3, w)
    assert out3.shape == (B2, F)
    assert jnp.allclose(out3.astype(jnp.float32), ref3.astype(jnp.float32),
                        atol=2e-2, rtol=2e-2)

    print("KERNEL_OK")
</pallas_src>

<mosaic_0001>
module attributes {stable_mosaic.version = 11 : i64} {
  func.func @_weight_layer_kernel(%arg0: i32, %arg1: memref<2x8x32xf32, #tpu.memory_space<vmem>>, %arg2: memref<1x8x1xf32, #tpu.memory_space<vmem>>, %arg3: memref<2x32xf32, #tpu.memory_space<vmem>>) attributes {dimension_semantics = [#tpu.dimension_semantics<parallel>], iteration_bounds = array<i64: 1>, scalar_prefetch = 0 : i64, scratch_operands = 0 : i64, tpu.core_type = #tpu.core_type<tc>, window_params = [{transform_indices = @transform_0, window_bounds = array<i64: 2, 8, 32>}, {pipeline_mode = #tpu.pipeline_mode<synchronous>, transform_indices = @transform_1, window_bounds = array<i64: 1, 8, 1>}, {transform_indices = @transform_2, window_bounds = array<i64: 2, 32>}]} {
    %c0 = arith.constant 0 : index
    %c0_0 = arith.constant 0 : index
    %c0_1 = arith.constant 0 : index
    %0 = vector.load %arg1[%c0, %c0_0, %c0_1] : memref<2x8x32xf32, #tpu.memory_space<vmem>>, vector<2x8x32xf32>
    %c0_2 = arith.constant 0 : index
    %c0_3 = arith.constant 0 : index
    %c0_4 = arith.constant 0 : index
    %1 = vector.load %arg2[%c0_2, %c0_3, %c0_4] : memref<1x8x1xf32, #tpu.memory_space<vmem>>, vector<1x8x1xf32>
    %2 = vector.broadcast %1 : vector<1x8x1xf32> to vector<2x8x32xf32>
    %3 = arith.mulf %0, %2 : vector<2x8x32xf32>
    %cst = arith.constant dense<0.000000e+00> : vector<2x32xf32>
    %4 = vector.multi_reduction <add>, %3, %cst [1] : vector<2x8x32xf32> to vector<2x32xf32>
    %c0_5 = arith.constant 0 : index
    %c0_6 = arith.constant 0 : index
    %5 = vector.load %arg3[%c0_5, %c0_6] : memref<2x32xf32, #tpu.memory_space<vmem>>, vector<2x32xf32>
    tpu.vector_store %arg3[%c0_5, %c0_6], %4 {strides = array<i32>} : memref<2x32xf32, #tpu.memory_space<vmem>>, vector<2x32xf32>,
    return
  }
  func.func @transform_0(%arg0: i32) -> (i32, i32, i32) {
    %c0_i32 = arith.constant 0 : i32
    %c0_i32_0 = arith.constant 0 : i32
    %c0_i32_1 = arith.constant 0 : i32
    return %arg0, %c0_i32, %c0_i32_0 : i32, i32, i32
  }
  func.func @transform_1(%arg0: i32) -> (i32, i32, i32) {
    %c0_i32 = arith.constant 0 : i32
    %c0_i32_0 = arith.constant 0 : i32
    %c0_i32_1 = arith.constant 0 : i32
    %c0_i32_2 = arith.constant 0 : i32
    return %c0_i32, %c0_i32_0, %c0_i32_1 : i32, i32, i32
  }
  func.func @transform_2(%arg0: i32) -> (i32, i32) {
    %c0_i32 = arith.constant 0 : i32
    %c0_i32_0 = arith.constant 0 : i32
    return %arg0, %c0_i32 : i32, i32
  }
}

</mosaic_0001>

<bundles_post_ra>
// kernel: tpu_custom_call.1
= control target key start
LH: loop header
LB: loop body
LE: loop exit
PB: predicated region body
PF: predicated region fallthrough
CT: control target
= control target key end

     0   :  { %7 = vsyncpa [#allocation3], 0  ;;  %s174_s0 = inlined_call_operand.hbm [shape: f32[2,8,32], index: 0, kind: input, shape index: {}]   ;;  %s175_s1 = inlined_call_operand.vmem [shape: f32[1,8,1], index: 1, kind: input, shape index: {}]   ;;  %s176_s2 = inlined_call_operand.hbm [shape: f32[2,32], index: 2, kind: output, shape index: {}]  }
   0x1   :  { %8 = vsyncpa [#allocation4], 0  ;;  %s127_s9 = smov [#allocation2]   ;;  %s79_s13 = scalar_lea.hbm %s174_s0, 256 }
   0x2   :  { %s14_s10 = sshll.u32 %s127_s9, 4  ;;  %p80_p0 = scmp.ne.s32.totalorder %s174_s0, %s79_s13  ;;  %s15_s10 = int_to_ptr.vmem [resolvable:$true] %s14_s10 }
   0x3   :  { %p83_p1 = scmp.lt.u32.totalorder %s79_s13, %s174_s0 }
   0x5   :  { %p85_p2 = pnand %p83_p1, %p80_p0 }
   0x7   :  { %88 = shalt.err (!%p85_p2)
}
   0x8   :  { %s89_s18 = scalar_lea.vmem %s15_s10, 256  ;;  %p94_p4 = scmp.lt.s32.totalorder %s15_s10, %s15_s10 }
   0x9   :  { %p90_p3 = scmp.ne.s32.totalorder %s15_s10, %s89_s18  ;;  %p95_p5 = scmp.lt.s32.totalorder %s89_s18, %s89_s18 }
   0xb   :  { %p96_p6 = por %p95_p5, %p94_p4 }
   0xd   :  { %p97_p7 = pnand %p96_p6, %p90_p3 }
   0xf   :  { %100 = shalt.err (!%p97_p7)
}
  0x10   :  { %s128_s19 = smov 128   ;;  %s129_s20 = smov 8  }
  0x11   :  { %20 = dma.hbm_to_vmem [thread:$0]  %s174_s0, 256, %s15_s10, [#allocation3], %s128_s19, %s128_s19, %s129_s20  }
  0x12   :  { %123 = dma.done.wait [#allocation3], 256  }
  0x13   :  { %124 = vsyncadd [#allocation3], 4294967040  ;;  %v130_v0 = vmov 0   ;;  %v28_v1 = vld [vmem:[%s175_s1] sm:$0xff]  ;;  %v27_v3 = vld [vmem:[#allocation2 + $0x8] sm:$0xff]  ;;  %vm36_vm0 = vcmask 261120  }
  0x14   :  { %78 = vset.pattern.permute.xlu0 %v130_v0  ;;  %v26_v2 = vld [vmem:[#allocation2] sm:$0xff]  ;;  %s131_s0 = smov [#allocation5]   ;;  %vm53_vm1 = vcmask 1041409   ;;  %vm56_vm2 = vcmask 254976  }
  0x15   :  { %31 = vperm.xlu0 %78, %v28_v1   ;;  %s64_s1 = sshll.u32 %s131_s0, 4  ;;  %s65_s1 = int_to_ptr.vmem [resolvable:$true] %s64_s1 }
  0x16   :  { %s101_s25 = scalar_lea.vmem %s65_s1, 32  ;;  %p106_p9 = scmp.lt.s32.totalorder %s65_s1, %s65_s1 }
  0x17   :  { %p102_p8 = scmp.ne.s32.totalorder %s65_s1, %s101_s25  ;;  %p107_p10 = scmp.lt.s32.totalorder %s101_s25, %s101_s25 }
  0x19   :  { %p108_p11 = por %p107_p10, %p106_p9 }
  0x1b   :  { %p109_p12 = pnand %p108_p11, %p102_p8 }
  0x94   :  { %v32_v4 = vpop.permute.xlu0 %31 }
  0x95   :  { %v34_v5 = vmul.f32 %v32_v4, %v26_v2  ;;  %v35_v6 = vmul.f32 %v32_v4, %v27_v3 }
  0x97   :  { %v37_v7 = vsel %vm36_vm0, %v34_v5, 0.0  ;;  %v44_v8 = vsel %vm36_vm0, %v35_v6, 0.0 }
  0x98   :  { %v38_v9 = vrot.slane %v37_v7, 4  ;;  %v45_v10 = vrot.slane %v44_v8, 4 }
  0x9a   :  { %v39_v11 = vadd.f32 %v38_v9, %v37_v7  ;;  %v46_v12 = vadd.f32 %v45_v10, %v44_v8 }
  0x9c   :  { %v40_v13 = vrot.slane %v39_v11, 2  ;;  %v47_v14 = vrot.slane %v46_v12, 2 }
  0x9e   :  { %v41_v15 = vadd.f32 %v40_v13, %v39_v11  ;;  %v48_v16 = vadd.f32 %v47_v14, %v46_v12 }
  0xa0   :  { %v42_v17 = vrot.slane %v41_v15, 1  ;;  %v49_v18 = vrot.slane %v48_v16, 1 }
  0xa2   :  { %v43_v19 = vadd.f32 %v42_v17, %v41_v15  ;;  %v50_v20 = vadd.f32 %v49_v18, %v48_v16 }
  0xa4   :  { %v54_v21 = vsel %vm53_vm1, %v50_v20, %v43_v19 }
  0xa5   :  { %57 = vst.msk [vmem:[#allocation5] sm:$0x3] %vm56_vm2, %v54_v21 }
  0xa6   :  { %112 = shalt.err (!%p109_p12)
}
  0xa7   :  { %s113_s28 = scalar_lea.hbm %s176_s2, 32 }
  0xa8   :  { %p114_p13 = scmp.ne.s32.totalorder %s176_s2, %s113_s28  ;;  %p117_p0 = scmp.lt.u32.totalorder %s113_s28, %s176_s2 }
  0xaa   :  { %p119_p1 = pnand %p117_p0, %p114_p13 }
  0xac   :  { %122 = shalt.err (!%p119_p1)
}
  0xad   :  { %67 = dma.vmem_to_hbm [thread:$0]  %s65_s1, 32, %s176_s2, [#allocation4]  }
  0xae   :  { %125 = dma.done.wait [#allocation4], 32  }
  0xaf   :  { %126 = vsyncadd [#allocation4], 4294967264 }
  0xb0   :  { %71 = vsyncpa [#allocation3], 1 }
  0xb1   :  { %72 = vsyncpa [#allocation4], 1 }

</bundles_post_ra>
